<compile_context>
chip_gen: v7x
topology: tpu7x:2x2x1
jax: 0.10.0
libtpu: 0.0.40
codegen_flags: <defaults>
</compile_context>

<pallas_src>
import functools

import jax
import jax.numpy as jnp
from jax import lax
from jax.experimental import pallas as pl
from jax.experimental.pallas import tpu as pltpu


def _sor_mask_kernel(x_ref, mask_ref, *, k, alpha):
    """SOR keep-mask for a block of Bt clouds.

    x_ref:    VMEM ref, shape (Bt, 3, K) float32   (channels-first points)
    mask_ref: VMEM ref, shape (Bt, 1, K) int32     (1 = keep, 0 = outlier)
    """
    x = x_ref[...].astype(jnp.float32)                 # [Bt, 3, K]
    bt, c_dim, num_pts = x.shape

    # Pairwise squared distances on the VPU: d[b, j, i] = sum_c (x[b,c,j]-x[b,c,i])^2.
    d = None
    for c in range(c_dim):
        xc = x[:, c, :]                                # [Bt, K]  (lane-dense)
        diff = xc[:, :, None] - xc[:, None, :]         # [Bt, K, K]
        sq = diff * diff
        d = sq if d is None else d + sq

    # Mask the diagonal (self distance) to +inf once; then only k min-passes needed.
    row_iota = lax.broadcasted_iota(jnp.int32, (1, num_pts, 1), 1)   # j index
    col_iota = lax.broadcasted_iota(jnp.int32, (1, 1, num_pts), 2)   # i index
    inf = jnp.float32(jnp.inf)
    d = jnp.where(row_iota == col_iota, inf, d)

    # k smallest neighbor distances per point i (reduce over the j / sublane axis).
    knn_sum = jnp.zeros((bt, 1, num_pts), jnp.float32)
    for t in range(k):
        cur_min = jnp.min(d, axis=1, keepdims=True)                  # [Bt, 1, K]
        knn_sum = knn_sum + cur_min
        if t + 1 < k:
            # Remove exactly one (lowest-index) occurrence of the current minimum.
            first_j = jnp.min(jnp.where(d == cur_min, row_iota, num_pts),
                              axis=1, keepdims=True)                 # [Bt, 1, K]
            d = jnp.where(row_iota == first_j, inf, d)

    value = knn_sum * (1.0 / k)                                      # mean kNN dist, [Bt, 1, K]
    mean = jnp.mean(value, axis=2, keepdims=True)                    # [Bt, 1, 1]
    centered = value - mean
    # torch.std default is the unbiased estimator (divide by K - 1).
    std = jnp.sqrt(jnp.sum(centered * centered, axis=2, keepdims=True)
                   / float(num_pts - 1))
    threshold = mean + alpha * std
    mask_ref[...] = (value <= threshold).astype(jnp.int32)           # lane-dense store


def _pick_block_batch(batch, num_pts, budget_bytes=8 << 20):
    """Largest divisor of `batch` whose in-kernel working set fits the budget."""
    per_cloud = max(1, 3 * num_pts * num_pts * 4)   # d + a couple of [K,K] temporaries
    cap = max(1, budget_bytes // per_cloud)
    bt = min(batch, cap)
    while batch % bt:
        bt -= 1
    return bt


def sor_defense_forward(x, *, k=2, alpha=1.1, npoint=24):
    """JAX/Pallas equivalent of SORDefense.forward.

    Args:
      x: [B, 3, K] float32 point cloud (channels-first, like the PyTorch module).
    Returns:
      [B, 3, npoint] float32 (outliers removed, remaining points tiled to npoint).
    """
    B, C, K = x.shape
    assert C == 3
    assert 1 <= k < K and K >= 2
    x = x.astype(jnp.float32)

    Bt = _pick_block_batch(B, K)
    kernel = functools.partial(_sor_mask_kernel, k=k, alpha=alpha)
    mask = pl.pallas_call(
        kernel,
        out_shape=jax.ShapeDtypeStruct((B, 1, K), jnp.int32),
        grid=(B // Bt,),
        in_specs=[pl.BlockSpec((Bt, 3, K), lambda b: (b, 0, 0))],
        out_specs=pl.BlockSpec((Bt, 1, K), lambda b: (b, 0, 0)),
        compiler_params=pltpu.CompilerParams(dimension_semantics=("parallel",)),
    )(x)                                                             # [B, 1, K] int32

    keep = mask[:, 0, :] > 0                                         # [B, K]
    keep_i = keep.astype(jnp.int32)
    n_kept = jnp.sum(keep_i, axis=1)                                 # [B]; always >= 1

    # Compaction via prefix sum + scatter (O(K), no multi-pass XLA sort):
    # order[b, r] = original index of the r-th kept point of cloud b.
    ranks = jnp.cumsum(keep_i, axis=1) - 1                           # slot of each kept point
    slot = jnp.where(keep, ranks, K)                                 # dropped points -> trash col
    src = jnp.broadcast_to(jnp.arange(K, dtype=jnp.int32)[None, :], (B, K))
    order = jnp.zeros((B, K + 1), jnp.int32).at[
        jnp.arange(B)[:, None], slot].set(src)[:, :K]

    # Duplicate-to-npoint (process_data): output point j of cloud b = kept[b][j % n_kept[b]].
    j = jnp.arange(npoint, dtype=jnp.int32)
    idx_mod = j[None, :] % n_kept[:, None]                           # [B, npoint]
    sel_idx = jnp.take_along_axis(order, idx_mod, axis=1)            # [B, npoint]
    idx3 = jnp.broadcast_to(sel_idx[:, None, :], (B, 3, npoint))
    return jnp.take_along_axis(x, idx3, axis=2)                      # [B, 3, npoint]


if __name__ == "__main__":
    key = jax.random.PRNGKey(0)
    B, C, K = 2, 3, 16          # small shapes: 16 input points per cloud
    x = jax.random.normal(key, (B, C, K), dtype=jnp.float32)
    out = sor_defense_forward(x, k=2, alpha=1.1, npoint=24)
    jax.block_until_ready(out)
    assert out.shape == (B, 3, 24), out.shape
    assert jnp.all(jnp.isfinite(out))
    print("KERNEL_OK")
</pallas_src>

<mosaic_0001>
module attributes {stable_mosaic.version = 11 : i64} {
  func.func @_sor_mask_kernel(%arg0: i32, %arg1: memref<2x3x16xf32, #tpu.memory_space<vmem>>, %arg2: memref<2x1x16xi32, #tpu.memory_space<vmem>>) attributes {dimension_semantics = [#tpu.dimension_semantics<parallel>], iteration_bounds = array<i64: 1>, scalar_prefetch = 0 : i64, scratch_operands = 0 : i64, tpu.core_type = #tpu.core_type<tc>, window_params = [{transform_indices = @transform_0, window_bounds = array<i64: 2, 3, 16>}, {transform_indices = @transform_1, window_bounds = array<i64: 2, 1, 16>}]} {
    %c0 = arith.constant 0 : index
    %c0_0 = arith.constant 0 : index
    %c0_1 = arith.constant 0 : index
    %0 = vector.load %arg1[%c0, %c0_0, %c0_1] : memref<2x3x16xf32, #tpu.memory_space<vmem>>, vector<2x3x16xf32>
    %1 = vector.extract_strided_slice %0 {offsets = [0, 0, 0], sizes = [2, 1, 16], strides = [1, 1, 1]} : vector<2x3x16xf32> to vector<2x1x16xf32>
    %2 = vector.shape_cast %1 : vector<2x1x16xf32> to vector<2x16xf32>
    %3 = vector.shape_cast %2 : vector<2x16xf32> to vector<2x16x1xf32>
    %4 = vector.shape_cast %2 : vector<2x16xf32> to vector<2x1x16xf32>
    %5 = vector.broadcast %3 : vector<2x16x1xf32> to vector<2x16x16xf32>
    %6 = vector.broadcast %4 : vector<2x1x16xf32> to vector<2x16x16xf32>
    %7 = arith.subf %5, %6 : vector<2x16x16xf32>
    %8 = arith.mulf %7, %7 : vector<2x16x16xf32>
    %9 = vector.extract_strided_slice %0 {offsets = [0, 1, 0], sizes = [2, 1, 16], strides = [1, 1, 1]} : vector<2x3x16xf32> to vector<2x1x16xf32>
    %10 = vector.shape_cast %9 : vector<2x1x16xf32> to vector<2x16xf32>
    %11 = vector.shape_cast %10 : vector<2x16xf32> to vector<2x16x1xf32>
    %12 = vector.shape_cast %10 : vector<2x16xf32> to vector<2x1x16xf32>
    %13 = vector.broadcast %11 : vector<2x16x1xf32> to vector<2x16x16xf32>
    %14 = vector.broadcast %12 : vector<2x1x16xf32> to vector<2x16x16xf32>
    %15 = arith.subf %13, %14 : vector<2x16x16xf32>
    %16 = arith.mulf %15, %15 : vector<2x16x16xf32>
    %17 = arith.addf %8, %16 : vector<2x16x16xf32>
    %18 = vector.extract_strided_slice %0 {offsets = [0, 2, 0], sizes = [2, 1, 16], strides = [1, 1, 1]} : vector<2x3x16xf32> to vector<2x1x16xf32>
    %19 = vector.shape_cast %18 : vector<2x1x16xf32> to vector<2x16xf32>
    %20 = vector.shape_cast %19 : vector<2x16xf32> to vector<2x16x1xf32>
    %21 = vector.shape_cast %19 : vector<2x16xf32> to vector<2x1x16xf32>
    %22 = vector.broadcast %20 : vector<2x16x1xf32> to vector<2x16x16xf32>
    %23 = vector.broadcast %21 : vector<2x1x16xf32> to vector<2x16x16xf32>
    %24 = arith.subf %22, %23 : vector<2x16x16xf32>
    %25 = arith.mulf %24, %24 : vector<2x16x16xf32>
    %26 = arith.addf %17, %25 : vector<2x16x16xf32>
    %27 = tpu.iota {dimensions = array<i32: 1>} : vector<1x16x1xi32>
    %28 = tpu.iota {dimensions = array<i32: 2>} : vector<1x1x16xi32>
    %29 = vector.broadcast %27 : vector<1x16x1xi32> to vector<1x16x16xi32>
    %30 = vector.broadcast %28 : vector<1x1x16xi32> to vector<1x16x16xi32>
    %31 = arith.cmpi eq, %29, %30 : vector<1x16x16xi32>
    %cst = arith.constant 0x7F800000 : f32
    %32 = vector.shape_cast %31 : vector<1x16x16xi1> to vector<1x16x16xi1>
    %33 = vector.broadcast %32 : vector<1x16x16xi1> to vector<2x16x16xi1>
    %34 = vector.broadcast %cst : f32 to vector<2x16x16xf32>
    %35 = arith.select %33, %34, %26 : vector<2x16x16xi1>, vector<2x16x16xf32>
    %cst_2 = arith.constant 0.000000e+00 : f32
    %36 = vector.broadcast %cst_2 : f32 to vector<2x1x16xf32>
    %cst_3 = arith.constant dense<0x7F800000> : vector<2x16xf32>
    %37 = vector.multi_reduction <minimumf>, %35, %cst_3 [1] : vector<2x16x16xf32> to vector<2x16xf32>
    %38 = vector.shape_cast %37 : vector<2x16xf32> to vector<2x1x16xf32>
    %39 = arith.addf %36, %38 : vector<2x1x16xf32>
    %40 = vector.broadcast %38 : vector<2x1x16xf32> to vector<2x16x16xf32>
    %41 = arith.cmpf oeq, %35, %40 : vector<2x16x16xf32>
    %c16_i32 = arith.constant 16 : i32
    %42 = vector.shape_cast %27 : vector<1x16x1xi32> to vector<1x16x1xi32>
    %43 = vector.broadcast %42 : vector<1x16x1xi32> to vector<2x16x16xi32>
    %44 = vector.broadcast %c16_i32 : i32 to vector<2x16x16xi32>
    %45 = arith.select %41, %43, %44 : vector<2x16x16xi1>, vector<2x16x16xi32>
    %cst_4 = arith.constant dense<2147483647> : vector<2x16xi32>
    %46 = vector.multi_reduction <minsi>, %45, %cst_4 [1] : vector<2x16x16xi32> to vector<2x16xi32>
    %47 = vector.shape_cast %46 : vector<2x16xi32> to vector<2x1x16xi32>
    %48 = vector.broadcast %27 : vector<1x16x1xi32> to vector<2x16x16xi32>
    %49 = vector.broadcast %47 : vector<2x1x16xi32> to vector<2x16x16xi32>
    %50 = arith.cmpi eq, %48, %49 : vector<2x16x16xi32>
    %cst_5 = arith.constant 0x7F800000 : f32
    %51 = vector.broadcast %cst_5 : f32 to vector<2x16x16xf32>
    %52 = arith.select %50, %51, %35 : vector<2x16x16xi1>, vector<2x16x16xf32>
    %cst_6 = arith.constant dense<0x7F800000> : vector<2x16xf32>
    %53 = vector.multi_reduction <minimumf>, %52, %cst_6 [1] : vector<2x16x16xf32> to vector<2x16xf32>
    %54 = vector.shape_cast %53 : vector<2x16xf32> to vector<2x1x16xf32>
    %55 = arith.addf %39, %54 : vector<2x1x16xf32>
    %cst_7 = arith.constant 5.000000e-01 : f32
    %56 = vector.broadcast %cst_7 : f32 to vector<2x1x16xf32>
    %57 = arith.mulf %55, %56 : vector<2x1x16xf32>
    %cst_8 = arith.constant dense<0.000000e+00> : vector<2x1xf32>
    %58 = vector.multi_reduction <add>, %57, %cst_8 [2] : vector<2x1x16xf32> to vector<2x1xf32>
    %59 = vector.shape_cast %58 : vector<2x1xf32> to vector<2x1x1xf32>
    %cst_9 = arith.constant 1.600000e+01 : f32
    %60 = vector.broadcast %cst_9 : f32 to vector<2x1x1xf32>
    %61 = arith.divf %59, %60 : vector<2x1x1xf32>
    %62 = vector.broadcast %61 : vector<2x1x1xf32> to vector<2x1x16xf32>
    %63 = arith.subf %57, %62 : vector<2x1x16xf32>
    %64 = arith.mulf %63, %63 : vector<2x1x16xf32>
    %cst_10 = arith.constant dense<0.000000e+00> : vector<2x1xf32>
    %65 = vector.multi_reduction <add>, %64, %cst_10 [2] : vector<2x1x16xf32> to vector<2x1xf32>
    %66 = vector.shape_cast %65 : vector<2x1xf32> to vector<2x1x1xf32>
    %cst_11 = arith.constant 1.500000e+01 : f32
    %67 = vector.broadcast %cst_11 : f32 to vector<2x1x1xf32>
    %68 = arith.divf %66, %67 : vector<2x1x1xf32>
    %69 = math.sqrt %68 : vector<2x1x1xf32>
    %cst_12 = arith.constant 1.100000e+00 : f32
    %70 = vector.broadcast %cst_12 : f32 to vector<2x1x1xf32>
    %71 = arith.mulf %70, %69 : vector<2x1x1xf32>
    %72 = arith.addf %61, %71 : vector<2x1x1xf32>
    %73 = vector.broadcast %72 : vector<2x1x1xf32> to vector<2x1x16xf32>
    %74 = arith.cmpf ole, %57, %73 : vector<2x1x16xf32>
    %75 = arith.extui %74 : vector<2x1x16xi1> to vector<2x1x16xi32>
    %c0_13 = arith.constant 0 : index
    %c0_14 = arith.constant 0 : index
    %c0_15 = arith.constant 0 : index
    %76 = vector.load %arg2[%c0_13, %c0_14, %c0_15] : memref<2x1x16xi32, #tpu.memory_space<vmem>>, vector<2x1x16xi32>
    tpu.vector_store %arg2[%c0_13, %c0_14, %c0_15], %75 {strides = array<i32>} : memref<2x1x16xi32, #tpu.memory_space<vmem>>, vector<2x1x16xi32>,
    return
  }
  func.func @transform_0(%arg0: i32) -> (i32, i32, i32) {
    %c0_i32 = arith.constant 0 : i32
    %c0_i32_0 = arith.constant 0 : i32
    %c0_i32_1 = arith.constant 0 : i32
    return %arg0, %c0_i32, %c0_i32_0 : i32, i32, i32
  }
  func.func @transform_1(%arg0: i32) -> (i32, i32, i32) {
    %c0_i32 = arith.constant 0 : i32
    %c0_i32_0 = arith.constant 0 : i32
    %c0_i32_1 = arith.constant 0 : i32
    return %arg0, %c0_i32, %c0_i32_0 : i32, i32, i32
  }
}

</mosaic_0001>

<bundles_post_ra>
// kernel: tpu_custom_call.1
= control target key start
LH: loop header
LB: loop body
LE: loop exit
PB: predicated region body
PF: predicated region fallthrough
CT: control target
= control target key end

     0   :  { %v11_v0 = vlaneseq  ;;  %s378_s0 = inlined_call_operand.vmem [shape: f32[2,3,16], index: 0, kind: input, shape index: {}]   ;;  %s379_s1 = inlined_call_operand.hbm [shape: s32[2,1,16], index: 1, kind: output, shape index: {}]  }
   0x1   :  { %6 = vsyncpa [#allocation3], 0  ;;  %v10_v2 = vld [vmem:[%s378_s0 + $0x4] sm:$0x7]  ;;  %v9_v3 = vld [vmem:[%s378_s0] sm:$0x7] }
   0x2   :  { %v318_v1 = vshrl.u32 %v11_v0, 7  ;;  %v113_v32 = vand.u32 127, %v11_v0  ;;  %vm124_vm0 = vcmask 130048   ;;  %s304_s0 = smov [#allocation2]  }
   0x3   :  { %s261_s10 = sshll.u32 %s304_s0, 4  ;;  %s262_s10 = int_to_ptr.vmem [resolvable:$true] %s261_s10 }
   0x4   :  { %v13_v4 = vsub.s32 0, %v318_v1  ;;  %v43_v7 = vsub.s32 1, %v318_v1  ;;  %v77_v10 = vsub.s32 2, %v318_v1  ;;  %v330_v31 = vadd.s32 8, %v318_v1  ;;  %s280_s11 = scalar_lea.vmem %s262_s10, 32  ;;  %p285_p1 = scmp.lt.s32.totalorder %s262_s10, %s262_s10 }
   0x5   :  { %vm114_vm2 = vcmp.eq.s32.totalorder %v318_v1, %v113_v32  ;;  %p281_p0 = scmp.ne.s32.totalorder %s262_s10, %s280_s11  ;;  %p286_p2 = scmp.lt.s32.totalorder %s280_s11, %s280_s11 }
   0x6   :  { %v25_v5 = vrot.slane %v10_v2, %v13_v4  ;;  %v14_v6 = vrot.slane %v9_v3, %v13_v4  ;;  %v44_v8 = vrot.slane %v9_v3, %v43_v7  ;;  %v55_v9 = vrot.slane %v10_v2, %v43_v7 }
   0x7   :  { %v78_v11 = vrot.slane %v9_v3, %v77_v10  ;;  %v89_v12 = vrot.slane %v10_v2, %v77_v10  ;;  %vm115_vm1 = vcmp.eq.s32.totalorder %v330_v31, %v113_v32  ;;  %p287_p3 = por %p286_p2, %p285_p1 }
   0x8   :  { %27 = vbcast.lane.b32.xlu1 %v25_v5, 256  ;;  %16 = vbcast.lane.b32.xlu0 %v14_v6, 256 }
   0x9   :  { %p288_p4 = pnand %p287_p3, %p281_p0 }
   0xc   :  { %31 = vbcast.lane.b32.xlu1 %v25_v5, 264  ;;  %20 = vbcast.lane.b32.xlu0 %v14_v6, 264 }
  0x10   :  { %50 = vbcast.lane.b32.xlu1 %v44_v8, 264  ;;  %46 = vbcast.lane.b32.xlu0 %v44_v8, 256 }
  0x14   :  { %61 = vbcast.lane.b32.xlu1 %v55_v9, 264  ;;  %57 = vbcast.lane.b32.xlu0 %v55_v9, 256 }
  0x18   :  { %84 = vbcast.lane.b32.xlu1 %v78_v11, 264  ;;  %80 = vbcast.lane.b32.xlu0 %v78_v11, 256 }
  0x1c   :  { %95 = vbcast.lane.b32.xlu1 %v89_v12, 264  ;;  %91 = vbcast.lane.b32.xlu0 %v89_v12, 256 }
  0x7a   :  { %v28_v13 = vpop.permute.xlu1 %27  ;;  %v17_v14 = vpop.permute.xlu0 %16 }
  0x7b   :  { %v33_v23 = vsub.f32 %v17_v14, %v14_v6  ;;  %v35_v29 = vsub.f32 %v28_v13, %v25_v5 }
  0x7d   :  { %v37_v35 = vmul.f32 %v33_v23, %v33_v23  ;;  %v39_v45 = vmul.f32 %v35_v29, %v35_v29 }
  0x7e   :  { %v32_v15 = vpop.permute.xlu1 %31  ;;  %v21_v16 = vpop.permute.xlu0 %20 }
  0x7f   :  { %v34_v24 = vsub.f32 %v21_v16, %v14_v6  ;;  %v36_v30 = vsub.f32 %v32_v15, %v25_v5 }
  0x81   :  { %v38_v36 = vmul.f32 %v34_v24, %v34_v24  ;;  %v40_v46 = vmul.f32 %v36_v30, %v36_v30 }
  0x82   :  { %v51_v17 = vpop.permute.xlu1 %50  ;;  %v47_v18 = vpop.permute.xlu0 %46 }
  0x83   :  { %v64_v19 = vsub.f32 %v51_v17, %v44_v8  ;;  %v63_v20 = vsub.f32 %v47_v18, %v44_v8 }
  0x85   :  { %v68_v27 = vmul.f32 %v64_v19, %v64_v19  ;;  %v67_v28 = vmul.f32 %v63_v20, %v63_v20 }
  0x86   :  { %v62_v21 = vpop.permute.xlu1 %61  ;;  %v58_v22 = vpop.permute.xlu0 %57 }
  0x87   :  { %v66_v25 = vsub.f32 %v62_v21, %v55_v9  ;;  %v65_v26 = vsub.f32 %v58_v22, %v55_v9  ;;  %v72_v41 = vadd.f32 %v68_v27, %v38_v36  ;;  %v71_v42 = vadd.f32 %v67_v28, %v37_v35 }
  0x89   :  { %v70_v39 = vmul.f32 %v66_v25, %v66_v25  ;;  %v69_v40 = vmul.f32 %v65_v26, %v65_v26 }
  0x8a   :  { %v85_v33 = vpop.permute.xlu1 %84  ;;  %v81_v34 = vpop.permute.xlu0 %80 }
  0x8b   :  { %v98_v37 = vsub.f32 %v85_v33, %v78_v11  ;;  %v97_v38 = vsub.f32 %v81_v34, %v78_v11  ;;  %v74_v53 = vadd.f32 %v70_v39, %v40_v46  ;;  %v73_v54 = vadd.f32 %v69_v40, %v39_v45 }
  0x8d   :  { %v102_v43 = vmul.f32 %v98_v37, %v98_v37  ;;  %v101_v44 = vmul.f32 %v97_v38, %v97_v38 }
  0x8e   :  { %v96_v47 = vpop.permute.xlu1 %95  ;;  %v92_v48 = vpop.permute.xlu0 %91 }
  0x8f   :  { %v106_v49 = vadd.f32 %v102_v43, %v72_v41  ;;  %v105_v50 = vadd.f32 %v101_v44, %v71_v42  ;;  %v100_v51 = vsub.f32 %v96_v47, %v89_v12  ;;  %v99_v52 = vsub.f32 %v92_v48, %v89_v12 }
  0x91   :  { %v121_v55 = vsel %vm115_vm1, inf, %v106_v49  ;;  %v120_v56 = vsel %vm114_vm2, inf, %v105_v50  ;;  %v104_v57 = vmul.f32 %v100_v51, %v100_v51  ;;  %v103_v58 = vmul.f32 %v99_v52, %v99_v52 }
  0x92   :  { %v126_v59 = vsel %vm124_vm0, %v121_v55, inf  ;;  %v125_v60 = vsel %vm124_vm0, %v120_v56, inf }
  0x93   :  { %v127_v61 = vmin.f32 %v125_v60, %v126_v59  ;;  %v108_v62 = vadd.f32 %v104_v57, %v74_v53  ;;  %v107_v63 = vadd.f32 %v103_v58, %v73_v54 }
  0x95   :  { %v128_v0 = vrot.slane %v127_v61, 4  ;;  %v123_v2 = vsel %vm115_vm1, inf, %v108_v62  ;;  %v122_v3 = vsel %vm114_vm2, inf, %v107_v63 }
  0x96   :  { %v135_v4 = vsel %vm124_vm0, %v123_v2, inf  ;;  %v134_v5 = vsel %vm124_vm0, %v122_v3, inf }
  0x97   :  { %v129_v6 = vmin.f32 %v127_v61, %v128_v0  ;;  %v136_v7 = vmin.f32 %v134_v5, %v135_v4 }
  0x99   :  { %v130_v8 = vrot.slane %v129_v6, 2  ;;  %v137_v9 = vrot.slane %v136_v7, 4 }
  0x9b   :  { %v131_v10 = vmin.f32 %v129_v6, %v130_v8  ;;  %v138_v11 = vmin.f32 %v136_v7, %v137_v9 }
  0x9d   :  { %v132_v12 = vrot.slane %v131_v10, 1  ;;  %v139_v13 = vrot.slane %v138_v11, 2 }
  0x9f   :  { %v133_v14 = vmin.f32 %v131_v10, %v132_v12  ;;  %v140_v15 = vmin.f32 %v138_v11, %v139_v13 }
  0xa1   :  { %vm145_vm3 = vcmp.eq.f32.partialorder %v120_v56, %v133_v14  ;;  %vm146_vm4 = vcmp.eq.f32.partialorder %v121_v55, %v133_v14  ;;  %v141_v16 = vrot.slane %v140_v15, 1 }
  0xa2   :  { %v149_v17 = vsel %vm145_vm3, %v318_v1, 16  ;;  %v150_v18 = vsel %vm146_vm4, %v330_v31, 16 }
  0xa3   :  { %v153_v19 = vsel %vm124_vm0, %v149_v17, 2147483647  ;;  %v154_v20 = vsel %vm124_vm0, %v150_v18, 2147483647  ;;  %v142_v21 = vmin.f32 %v140_v15, %v141_v16 }
  0xa4   :  { %vm155_vm5 = vcmp.lt.s32.totalorder %v153_v19, %v154_v20 }
  0xa5   :  { %v156_v22 = vsel %vm155_vm5, %v153_v19, %v154_v20  ;;  %vm147_vm6 = vcmp.eq.f32.partialorder %v122_v3, %v142_v21  ;;  %vm148_vm7 = vcmp.eq.f32.partialorder %v123_v2, %v142_v21 }
  0xa6   :  { %v157_v23 = vrot.slane %v156_v22, 4  ;;  %v151_v24 = vsel %vm147_vm6, %v318_v1, 16  ;;  %v152_v25 = vsel %vm148_vm7, %v330_v31, 16  ;;  %vm253_vm7 = vcmask 122880  }
  0xa7   :  { %v166_v26 = vsel %vm124_vm0, %v151_v24, 2147483647  ;;  %v167_v27 = vsel %vm124_vm0, %v152_v25, 2147483647 }
  0xa8   :  { %vm158_vm8 = vcmp.lt.s32.totalorder %v156_v22, %v157_v23  ;;  %vm168_vm9 = vcmp.lt.s32.totalorder %v166_v26, %v167_v27 }
  0xa9   :  { %v159_v28 = vsel %vm158_vm8, %v156_v22, %v157_v23  ;;  %v169_v29 = vsel %vm168_vm9, %v166_v26, %v167_v27 }
  0xaa   :  { %v160_v30 = vrot.slane %v159_v28, 2  ;;  %v170_v32 = vrot.slane %v169_v29, 4 }
  0xac   :  { %vm161_vm10 = vcmp.lt.s32.totalorder %v159_v28, %v160_v30  ;;  %vm171_vm11 = vcmp.lt.s32.totalorder %v169_v29, %v170_v32 }
  0xad   :  { %v162_v33 = vsel %vm161_vm10, %v159_v28, %v160_v30  ;;  %v172_v34 = vsel %vm171_vm11, %v169_v29, %v170_v32  ;;  %v305_v32 = vmov 0  }
  0xae   :  { %v163_v35 = vrot.slane %v162_v33, 1  ;;  %v173_v36 = vrot.slane %v172_v34, 2 }
  0xb0   :  { %vm164_vm12 = vcmp.lt.s32.totalorder %v162_v33, %v163_v35  ;;  %vm174_vm13 = vcmp.lt.s32.totalorder %v172_v34, %v173_v36 }
  0xb1   :  { %v165_v37 = vsel %vm164_vm12, %v162_v33, %v163_v35  ;;  %v175_v38 = vsel %vm174_vm13, %v172_v34, %v173_v36 }
  0xb2   :  { %vm179_vm14 = vcmp.eq.s32.totalorder %v318_v1, %v165_v37  ;;  %vm180_vm15 = vcmp.eq.s32.totalorder %v330_v31, %v165_v37  ;;  %v176_v39 = vrot.slane %v175_v38, 1 }
  0xb3   :  { %v183_v40 = vsel %vm179_vm14, inf, %v120_v56  ;;  %v184_v41 = vsel %vm180_vm15, inf, %v121_v55 }
  0xb4   :  { %v187_v42 = vsel %vm124_vm0, %v183_v40, inf  ;;  %v188_v43 = vsel %vm124_vm0, %v184_v41, inf  ;;  %vm177_vm1 = vcmp.lt.s32.totalorder %v175_v38, %v176_v39 }
  0xb5   :  { %v189_v44 = vmin.f32 %v187_v42, %v188_v43  ;;  %v178_v45 = vsel %vm177_vm1, %v175_v38, %v176_v39 }
  0xb6   :  { %vm181_vm2 = vcmp.eq.s32.totalorder %v318_v1, %v178_v45  ;;  %vm182_vm3 = vcmp.eq.s32.totalorder %v330_v31, %v178_v45 }
  0xb7   :  { %v190_v46 = vrot.slane %v189_v44, 4  ;;  %v185_v47 = vsel %vm181_vm2, inf, %v122_v3  ;;  %v186_v48 = vsel %vm182_vm3, inf, %v123_v2 }
  0xb8   :  { %v196_v49 = vsel %vm124_vm0, %v185_v47, inf  ;;  %v197_v50 = vsel %vm124_vm0, %v186_v48, inf }
  0xb9   :  { %v191_v51 = vmin.f32 %v189_v44, %v190_v46  ;;  %v198_v52 = vmin.f32 %v196_v49, %v197_v50 }
  0xbb   :  { %v199_v53 = vrot.slane %v198_v52, 4  ;;  %v192_v54 = vrot.slane %v191_v51, 2 }
  0xbd   :  { %v200_v55 = vmin.f32 %v198_v52, %v199_v53  ;;  %v193_v56 = vmin.f32 %v191_v51, %v192_v54 }
  0xbf   :  { %v194_v57 = vrot.slane %v193_v56, 1  ;;  %v201_v58 = vrot.slane %v200_v55, 2 }
  0xc1   :  { %v195_v59 = vmin.f32 %v193_v56, %v194_v57  ;;  %v202_v60 = vmin.f32 %v200_v55, %v201_v58 }
  0xc3   :  { %v205_v1 = vadd.f32 %v195_v59, %v133_v14  ;;  %v203_v61 = vrot.slane %v202_v60, 1 }
  0xc5   :  { %v207_v31 = vmul.f32 0.5, %v205_v1  ;;  %v204_v62 = vmin.f32 %v202_v60, %v203_v61 }
  0xc7   :  { %v209_v63 = vsel %vm124_vm0, %v207_v31, 0.0  ;;  %v206_v0 = vadd.f32 %v204_v62, %v142_v21 }
  0xc8   :  { %210 = vadd.xlane.f32.xlu0 %v209_v63 }
  0xc9   :  { %v208_v2 = vmul.f32 0.5, %v206_v0 }
  0xcb   :  { %v212_v3 = vsel %vm124_vm0, %v208_v2, 0.0 }
  0xcc   :  { %213 = vadd.xlane.f32.xlu1 %v212_v3 }
 0x155   :  { %v211_v4 = vpop.xlane.xlu0 %210 }
 0x156   :  { %v216_v5 = vmul.f32 0.0625, %v211_v4 }
 0x158   :  { %v218_v6 = vsub.f32 %v207_v31, %v216_v5 }
 0x159   :  { %v214_v7 = vpop.xlane.xlu1 %213 }
 0x15a   :  { %v217_v8 = vmul.f32 0.0625, %v214_v7  ;;  %v220_v9 = vmul.f32 %v218_v6, %v218_v6 }
 0x15c   :  { %v219_v10 = vsub.f32 %v208_v2, %v217_v8  ;;  %v222_v11 = vsel %vm124_vm0, %v220_v9, 0.0 }
 0x15d   :  { %223 = vadd.xlane.f32.xlu0 %v222_v11 }
 0x15e   :  { %v221_v12 = vmul.f32 %v219_v10, %v219_v10 }
 0x160   :  { %v225_v13 = vsel %vm124_vm0, %v221_v12, 0.0 }
 0x161   :  { %226 = vadd.xlane.f32.xlu0 %v225_v13 }
 0x1ea   :  { %v224_v14 = vpop.xlane.xlu0 %223 }
 0x1eb   :  { %v229_v15 = vmul.f32 0.06666667, %v224_v14 }
 0x1ed   :  { %276 = vrsqrt.f32 %v229_v15  ;;  %vm233_vm4 = vcmp.eq.f32.partialorder %v229_v15, inf  ;;  %v236_v20 = vand.u32 2147483648, %v229_v15  ;;  %vm235_vm5 = vcmp.eq.f32.partialorder %v229_v15, 0.0 }
 0x1ee   :  { %v227_v16 = vpop.xlane.xlu0 %226 }
 0x1ef   :  { %v230_v17 = vmul.f32 0.06666667, %v227_v16 }
 0x1f1   :  { %278 = vrsqrt.f32 %v230_v17  ;;  %vm240_vm6 = vcmp.eq.f32.partialorder %v230_v17, inf  ;;  %v243_v26 = vand.u32 2147483648, %v230_v17  ;;  %vm242_vm0 = vcmp.eq.f32.partialorder %v230_v17, 0.0 }
 0x1f7   :  { %v277_v18 = vpop.eup %276 }
 0x1f8   :  { %v232_v19 = vmul.f32 %v277_v18, %v229_v15 }
 0x1fa   :  { %v234_v21 = vsel %vm233_vm4, %v229_v15, %v232_v19 }
 0x1fb   :  { %v279_v22 = vpop.eup %278  ;;  %v237_v23 = vsel %vm235_vm5, %v236_v20, %v234_v21 }
 0x1fc   :  { %v239_v24 = vmul.f32 %v279_v22, %v230_v17  ;;  %v245_v25 = vmul.f32 1.1, %v237_v23 }
 0x1fe   :  { %v241_v27 = vsel %vm240_vm6, %v230_v17, %v239_v24  ;;  %v247_v28 = vadd.f32 %v245_v25, %v216_v5 }
 0x1ff   :  { %v244_v29 = vsel %vm242_vm0, %v243_v26, %v241_v27 }
 0x200   :  { %v246_v30 = vmul.f32 1.1, %v244_v29  ;;  %vm249_vm8 = vcmp.le.f32.partialorder %v207_v31, %v247_v28 }
 0x201   :  { %v251_v33 = vsel %vm249_vm8, 1, %v305_v32 }
 0x202   :  { %v248_v34 = vadd.f32 %v246_v30, %v217_v8  ;;  %254 = vst.msk [vmem:[#allocation2] sm:$0x1] %vm253_vm7, %v251_v33 }
 0x204   :  { %vm250_vm9 = vcmp.le.f32.partialorder %v208_v2, %v248_v34 }
 0x205   :  { %v252_v35 = vsel %vm250_vm9, 1, %v305_v32 }
 0x206   :  { %255 = vst.msk [vmem:[#allocation2 + $0x1] sm:$0x1] %vm253_vm7, %v252_v35 }
 0x207   :  { %291 = shalt.err (!%p288_p4)
}
 0x208   :  { %s292_s14 = scalar_lea.hbm %s379_s1, 32 }
 0x209   :  { %p293_p5 = scmp.ne.s32.totalorder %s379_s1, %s292_s14  ;;  %p296_p6 = scmp.lt.u32.totalorder %s292_s14, %s379_s1 }
 0x20b   :  { %p298_p7 = pnand %p296_p6, %p293_p5 }
 0x20d   :  { %301 = shalt.err (!%p298_p7)
}
 0x20e   :  { %s306_s19 = smov 16   ;;  %s307_s20 = smov 1  }
 0x20f   :  { %267 = dma.vmem_to_hbm [thread:$0]  %s262_s10, 32, %s379_s1, [#allocation3], %s306_s19, %s306_s19, %s307_s20  }
 0x210   :  { %302 = dma.done.wait [#allocation3], 32  }
 0x211   :  { %303 = vsyncadd [#allocation3], 4294967264 }
 0x212   :  { %271 = vsyncpa [#allocation3], 1 }

</bundles_post_ra>
